<compile_context>
chip_gen: v5e
topology: v5e:2x2
jax: 0.10.0
libtpu: 0.0.40
codegen_flags: <defaults>
</compile_context>

<pallas_src>
import jax
import jax.numpy as jnp
from jax import lax
from jax.experimental import pallas as pl
from jax.experimental.pallas import tpu as pltpu

# ---- module hyper-parameters (ConvBlock1d defaults) ----
B = 2          # batch
C_IN = 8       # in_channels (divisible by num_groups=4)
C_OUT = 16     # out_channels
L = 128        # sequence length
K = 3          # kernel_size
STRIDE = 1
PAD = 1
DIL = 1
G = 4          # num_groups
EPS = 1e-5

# TODO(synk): stride != 1 has no clean mapping onto this fused im2col kernel.
assert STRIDE == 1, "kernel implements stride=1 only"
assert C_IN % G == 0
# 'same'-length output is assumed (true for K=3, PAD=1, DIL=1).
assert (L + 2 * PAD - DIL * (K - 1) - 1) // STRIDE + 1 == L
assert (K - 1) * DIL <= 2 * PAD

BC_IN = B * C_IN            # 16  (batch folded onto sublanes)
BC_OUT = B * C_OUT          # 32
LP = L + 2 * PAD            # 130 (pre-padded length)


def convblock1d_kernel(xp_ref, p2_ref, gamma_ref, beta_ref, w_ref, bias_ref, o_ref):
    # xp_ref:    (B*C_IN, L+2*PAD)     activations, batch on sublanes, zero pad lanes
    # p2_ref:    (2*B*C_IN, 2*B*C_IN)  block-diag [P, P], P = group-average scatter
    # gamma_ref: (B*C_IN, 1)           GN weight, tiled over batch
    # beta_ref:  (B*C_IN, 1)           GN bias,   tiled over batch
    # w_ref:     (B*C_OUT, K*B*C_IN)   block-diagonal im2col conv weight
    # bias_ref:  (B*C_OUT, 1)          conv bias, tiled over batch
    # o_ref:     (B*C_OUT, L)
    x = xp_ref[...]                                        # (BC_IN, LP) f32

    # ---- GroupNorm: fused stats via ONE small matmul ----
    # Pad lanes of x are zero, so they do not perturb the sums; the divisor in
    # P2 only counts the L real elements per channel.
    ch_sum = jnp.sum(x, axis=1, keepdims=True)             # (BC_IN, 1)
    ch_sumsq = jnp.sum(x * x, axis=1, keepdims=True)       # (BC_IN, 1)
    stats = jnp.concatenate([ch_sum, ch_sumsq], axis=0)    # (2*BC_IN, 1)
    mom = jnp.dot(p2_ref[...], stats,
                  preferred_element_type=jnp.float32)      # (2*BC_IN, 1)
    mean_c = mom[:BC_IN]                                   # (BC_IN, 1)
    var_c = jnp.maximum(mom[BC_IN:] - mean_c * mean_c, 0.0)  # clamp one-pass var
    inv_c = lax.rsqrt(var_c + EPS)                         # EUP
    y = (x - mean_c) * (inv_c * gamma_ref[...]) + beta_ref[...]

    # ---- activation: ReLU ----
    y = jnp.maximum(y, 0.0)

    # restore the zero padding that GN/ReLU destroyed on the pad lanes
    lane = lax.broadcasted_iota(jnp.int32, (BC_IN, LP), 1)  # hoisted, built once
    y = jnp.where((lane >= PAD) & (lane < PAD + L), y, 0.0)

    # ---- Conv1d as ONE im2col matmul ----
    # tap k reads y_padded[:, l + k*DIL]  ==  y[:, l + k*DIL - PAD] with zero pad
    y_stack = jnp.concatenate(
        [y[:, k * DIL:k * DIL + L] for k in range(K)], axis=0)   # (K*BC_IN, L)
    acc = jnp.broadcast_to(bias_ref[...], (BC_OUT, L))
    acc = acc + jnp.dot(w_ref[...], y_stack,
                        preferred_element_type=jnp.float32)      # (BC_OUT, L)
    o_ref[...] = acc


def prepare_convblock1d_params(gamma, beta, w, bias):
    """One-time parameter reshuffle into the kernel-friendly layout (off hot path)."""
    cpg = C_IN // G
    # P[r, r'] = 1/((C_IN/G)*L) iff rows r, r' share the same (batch, group).
    grp = jnp.arange(BC_IN) // cpg                       # = b*G + c//cpg
    P = (grp[:, None] == grp[None, :]).astype(jnp.float32) / float(cpg * L)
    P2 = jnp.kron(jnp.eye(2, dtype=jnp.float32), P)      # (2*BC_IN, 2*BC_IN)
    # block-diagonal im2col conv weight:
    # W[b*C_OUT+co, k*B*C_IN + b*C_IN + ci] = w[co, ci, k]
    w_kmaj = jnp.transpose(w, (2, 0, 1))                 # (K, C_OUT, C_IN)
    eye_b = jnp.eye(B, dtype=w.dtype)
    w_big = jnp.concatenate(
        [jnp.kron(eye_b, w_kmaj[k]) for k in range(K)], axis=1)  # (BC_OUT, K*BC_IN)
    gamma2 = jnp.tile(gamma, B).reshape(BC_IN, 1)
    beta2 = jnp.tile(beta, B).reshape(BC_IN, 1)
    bias2 = jnp.tile(bias, B).reshape(BC_OUT, 1)
    return P2, gamma2, beta2, w_big, bias2


@jax.jit
def convblock1d(x, P2, gamma2, beta2, w_big, bias2):
    # x: (B, C_IN, L) f32
    x2 = x.reshape(BC_IN, L)                              # batch onto sublanes
    xp = jnp.pad(x2, ((0, 0), (PAD, PAD)))                # zero pad lanes for the conv
    vmem = pltpu.MemorySpace.VMEM
    out = pl.pallas_call(
        convblock1d_kernel,
        out_shape=jax.ShapeDtypeStruct((BC_OUT, L), jnp.float32),
        in_specs=[pl.BlockSpec(memory_space=vmem) for _ in range(6)],
        out_specs=pl.BlockSpec(memory_space=vmem),
    )(xp, P2, gamma2, beta2, w_big, bias2)
    return out.reshape(B, C_OUT, L)


def reference(x, gamma, beta, w, bias):
    # pure-JAX reference of the PyTorch forward
    xr = x.reshape(B, G, C_IN // G, L)
    mean = xr.mean(axis=(2, 3), keepdims=True)
    var = ((xr - mean) ** 2).mean(axis=(2, 3), keepdims=True)
    y = ((xr - mean) / jnp.sqrt(var + EPS)).reshape(B, C_IN, L)
    y = y * gamma[None, :, None] + beta[None, :, None]
    y = jnp.maximum(y, 0.0)
    out = lax.conv_general_dilated(
        y, w, window_strides=(STRIDE,), padding=((PAD, PAD),),
        rhs_dilation=(DIL,), dimension_numbers=("NCH", "OIH", "NCH"))
    return out + bias[None, :, None]


if __name__ == "__main__":
    key = jax.random.PRNGKey(0)
    kx, kg, kb, kw, kc = jax.random.split(key, 5)
    x = jax.random.normal(kx, (B, C_IN, L), dtype=jnp.float32)
    gamma = jax.random.normal(kg, (C_IN,), dtype=jnp.float32) * 0.1 + 1.0
    beta = jax.random.normal(kb, (C_IN,), dtype=jnp.float32) * 0.1
    w = jax.random.normal(kw, (C_OUT, C_IN, K), dtype=jnp.float32) * 0.1
    bias = jax.random.normal(kc, (C_OUT,), dtype=jnp.float32) * 0.1

    params = prepare_convblock1d_params(gamma, beta, w, bias)   # once, off hot path
    out = jax.block_until_ready(convblock1d(x, *params))
    ref = reference(x, gamma, beta, w, bias)
    assert out.shape == (B, C_OUT, L)
    err = float(jnp.abs(out - ref).max())
    assert jnp.allclose(out, ref, atol=1e-4, rtol=1e-4), err
    print("KERNEL_OK")
</pallas_src>

<mosaic_0001>
module attributes {stable_mosaic.version = 11 : i64} {
  func.func @convblock1d_kernel(%arg0: memref<16x130xf32, #tpu.memory_space<vmem>>, %arg1: memref<32x32xf32, #tpu.memory_space<vmem>>, %arg2: memref<16x1xf32, #tpu.memory_space<vmem>>, %arg3: memref<16x1xf32, #tpu.memory_space<vmem>>, %arg4: memref<32x48xf32, #tpu.memory_space<vmem>>, %arg5: memref<32x1xf32, #tpu.memory_space<vmem>>, %arg6: memref<32x128xf32, #tpu.memory_space<vmem>>) attributes {dimension_semantics = [], scalar_prefetch = 0 : i64, scratch_operands = 0 : i64, tpu.core_type = #tpu.core_type<tc>} {
    %c0 = arith.constant 0 : index
    %c0_0 = arith.constant 0 : index
    %0 = vector.load %arg0[%c0, %c0_0] : memref<16x130xf32, #tpu.memory_space<vmem>>, vector<16x130xf32>
    %cst = arith.constant dense<0.000000e+00> : vector<16xf32>
    %1 = vector.multi_reduction <add>, %0, %cst [1] : vector<16x130xf32> to vector<16xf32>
    %2 = vector.shape_cast %1 : vector<16xf32> to vector<16x1xf32>
    %3 = arith.mulf %0, %0 : vector<16x130xf32>
    %cst_1 = arith.constant dense<0.000000e+00> : vector<16xf32>
    %4 = vector.multi_reduction <add>, %3, %cst_1 [1] : vector<16x130xf32> to vector<16xf32>
    %5 = vector.shape_cast %4 : vector<16xf32> to vector<16x1xf32>
    %6 = tpu.concatenate %2, %5 in 0 : vector<16x1xf32>, vector<16x1xf32> -> vector<32x1xf32>
    %c0_2 = arith.constant 0 : index
    %c0_3 = arith.constant 0 : index
    %7 = vector.load %arg1[%c0_2, %c0_3] : memref<32x32xf32, #tpu.memory_space<vmem>>, vector<32x32xf32>
    %cst_4 = arith.constant dense<0.000000e+00> : vector<32x1xf32>
    %8 = tpu.matmul %7, %6, %cst_4 {dimension_numbers = #tpu.dot_dimension_numbers<[1], [0], [0], [1], [0, 0, 1, 1], [], []>} : vector<32x32xf32>, vector<32x1xf32>, vector<32x1xf32> -> vector<32x1xf32>
    %9 = vector.extract_strided_slice %8 {offsets = [0, 0], sizes = [16, 1], strides = [1, 1]} : vector<32x1xf32> to vector<16x1xf32>
    %10 = vector.extract_strided_slice %8 {offsets = [16, 0], sizes = [16, 1], strides = [1, 1]} : vector<32x1xf32> to vector<16x1xf32>
    %11 = arith.mulf %9, %9 : vector<16x1xf32>
    %12 = arith.subf %10, %11 : vector<16x1xf32>
    %cst_5 = arith.constant 0.000000e+00 : f32
    %13 = vector.broadcast %cst_5 : f32 to vector<16x1xf32>
    %14 = arith.maximumf %12, %13 : vector<16x1xf32>
    %cst_6 = arith.constant 9.99999974E-6 : f32
    %15 = vector.broadcast %cst_6 : f32 to vector<16x1xf32>
    %16 = arith.addf %14, %15 : vector<16x1xf32>
    %17 = math.rsqrt %16 : vector<16x1xf32>
    %18 = vector.broadcast %9 : vector<16x1xf32> to vector<16x130xf32>
    %19 = arith.subf %0, %18 : vector<16x130xf32>
    %c0_7 = arith.constant 0 : index
    %c0_8 = arith.constant 0 : index
    %20 = vector.load %arg2[%c0_7, %c0_8] : memref<16x1xf32, #tpu.memory_space<vmem>>, vector<16x1xf32>
    %21 = arith.mulf %17, %20 : vector<16x1xf32>
    %22 = vector.broadcast %21 : vector<16x1xf32> to vector<16x130xf32>
    %23 = arith.mulf %19, %22 : vector<16x130xf32>
    %c0_9 = arith.constant 0 : index
    %c0_10 = arith.constant 0 : index
    %24 = vector.load %arg3[%c0_9, %c0_10] : memref<16x1xf32, #tpu.memory_space<vmem>>, vector<16x1xf32>
    %25 = vector.broadcast %24 : vector<16x1xf32> to vector<16x130xf32>
    %26 = arith.addf %23, %25 : vector<16x130xf32>
    %cst_11 = arith.constant 0.000000e+00 : f32
    %27 = vector.broadcast %cst_11 : f32 to vector<16x130xf32>
    %28 = arith.maximumf %26, %27 : vector<16x130xf32>
    %29 = tpu.iota {dimensions = array<i32: 1>} : vector<16x130xi32>
    %c1_i32 = arith.constant 1 : i32
    %30 = vector.broadcast %c1_i32 : i32 to vector<16x130xi32>
    %31 = arith.cmpi sge, %29, %30 : vector<16x130xi32>
    %c129_i32 = arith.constant 129 : i32
    %32 = vector.broadcast %c129_i32 : i32 to vector<16x130xi32>
    %33 = arith.cmpi slt, %29, %32 : vector<16x130xi32>
    %34 = arith.andi %31, %33 : vector<16x130xi1>
    %cst_12 = arith.constant 0.000000e+00 : f32
    %35 = vector.broadcast %cst_12 : f32 to vector<16x130xf32>
    %36 = arith.select %34, %28, %35 : vector<16x130xi1>, vector<16x130xf32>
    %37 = vector.extract_strided_slice %36 {offsets = [0, 0], sizes = [16, 128], strides = [1, 1]} : vector<16x130xf32> to vector<16x128xf32>
    %38 = vector.extract_strided_slice %36 {offsets = [0, 1], sizes = [16, 128], strides = [1, 1]} : vector<16x130xf32> to vector<16x128xf32>
    %39 = vector.extract_strided_slice %36 {offsets = [0, 2], sizes = [16, 128], strides = [1, 1]} : vector<16x130xf32> to vector<16x128xf32>
    %40 = tpu.concatenate %37, %38, %39 in 0 : vector<16x128xf32>, vector<16x128xf32>, vector<16x128xf32> -> vector<48x128xf32>
    %c0_13 = arith.constant 0 : index
    %c0_14 = arith.constant 0 : index
    %41 = vector.load %arg5[%c0_13, %c0_14] : memref<32x1xf32, #tpu.memory_space<vmem>>, vector<32x1xf32>
    %42 = vector.shape_cast %41 : vector<32x1xf32> to vector<32x1xf32>
    %43 = vector.broadcast %42 : vector<32x1xf32> to vector<32x128xf32>
    %c0_15 = arith.constant 0 : index
    %c0_16 = arith.constant 0 : index
    %44 = vector.load %arg4[%c0_15, %c0_16] : memref<32x48xf32, #tpu.memory_space<vmem>>, vector<32x48xf32>
    %cst_17 = arith.constant dense<0.000000e+00> : vector<32x128xf32>
    %45 = tpu.matmul %44, %40, %cst_17 {dimension_numbers = #tpu.dot_dimension_numbers<[1], [0], [0], [1], [0, 0, 1, 1], [], []>} : vector<32x48xf32>, vector<48x128xf32>, vector<32x128xf32> -> vector<32x128xf32>
    %46 = arith.addf %43, %45 : vector<32x128xf32>
    %c0_18 = arith.constant 0 : index
    %c0_19 = arith.constant 0 : index
    %47 = vector.load %arg6[%c0_18, %c0_19] : memref<32x128xf32, #tpu.memory_space<vmem>>, vector<32x128xf32>
    tpu.vector_store %arg6[%c0_18, %c0_19], %46 {strides = array<i32>} : memref<32x128xf32, #tpu.memory_space<vmem>>, vector<32x128xf32>,
    return
  }
}

</mosaic_0001>

<bundles_post_ra>
// kernel: convblock1d.1
= control target key start
LH: loop header
LB: loop body
LE: loop exit
PB: predicated region body
PF: predicated region fallthrough
CT: control target
= control target key end

     0   :  { %vm28_vm0 = vcmask 15360   ;;  %s539_s0 = inlined_call_operand.vmem [shape: f32[16,130], index: 0, kind: input, shape index: {}]   ;;  %s540_s1 = inlined_call_operand.vmem [shape: f32[32,32], index: 1, kind: input, shape index: {}]   ;;  %s541_s2 = inlined_call_operand.vmem [shape: f32[16,1], index: 2, kind: input, shape index: {}]   ;;  %s542_s3 = inlined_call_operand.vmem [shape: f32[16,1], index: 3, kind: input, shape index: {}]   ;;  %s543_s4 = inlined_call_operand.vmem [shape: f32[32,48], index: 4, kind: input, shape index: {}]   ;;  %s544_s5 = inlined_call_operand.vmem [shape: f32[32,1], index: 5, kind: input, shape index: {}]   ;;  %s545_s6 = inlined_call_operand.hbm [shape: f32[32,128], index: 6, kind: output, shape index: {}]  }
   0x1   :  { %v437_v0 = vld [vmem:[%s539_s0 + $0x10] sm:$0xff]  ;;  %v442_v1 = vld [vmem:[%s539_s0 + $0x18] sm:$0xff]  ;;  %v452_v5 = vld [vmem:[%s539_s0 + $0x8] sm:$0xff] }
   0x2   :  { %v39_v2 = vmul.f32 %v437_v0, %v437_v0  ;;  %v40_v3 = vmul.f32 %v442_v1, %v442_v1  ;;  %v33_v4 = vsel %vm28_vm0, %v442_v1, 0.0 }
   0x3   :  { %11 = vsyncpa [#allocation3], 0  ;;  %v34_v6 = vadd.f32 %v33_v4, %v437_v0  ;;  %v458_v8 = vld [vmem:[%s539_s0] sm:$0xff]  ;;  %v38_v9 = vmul.f32 %v452_v5, %v452_v5  ;;  %v29_v11 = vsel %vm28_vm0, %v452_v5, 0.0  ;;  %v393_v16 = vmov 0   ;;  %v50_v22 = vld [vmem:[%s540_s1 + $0x8] sm:$0xff] }
   0x4   :  { %v45_v7 = vsel %vm28_vm0, %v40_v3, 0.0  ;;  %v37_v12 = vmul.f32 %v458_v8, %v458_v8  ;;  %v30_v14 = vadd.f32 %v29_v11, %v458_v8  ;;  %340 = vset.pattern.permute.xlu2 %v393_v16  ;;  %342 = vset.pattern.permute.xlu1 %v393_v16  ;;  %v49_v21 = vld [vmem:[%s540_s1] sm:$0xff]  ;;  %vm53_vm1 = vcmask 261120   ;;  %v51_v23 = vld [vmem:[%s540_s1 + $0x10] sm:$0xff]  ;;  %v52_v24 = vld [vmem:[%s540_s1 + $0x18] sm:$0xff]  ;;  %s395_s20 = smov 127  }
   0x5   :  { %v46_v10 = vadd.f32 %v45_v7, %v39_v2  ;;  %35 = vadd.xlane.f32.xlu1 %v34_v6  ;;  %v41_v13 = vsel %vm28_vm0, %v38_v9, 0.0  ;;  %341 = vset.pattern.permute.xlu0 %v393_v16  ;;  %v156_v31 = vld [vmem:[%s542_s3 + $0x8] sm:$0xff]  ;;  %v155_v37 = vld [vmem:[%s542_s3] sm:$0xff]  ;;  %v175_v61 = vlaneseq  ;;  %vm213_vm10 = vcmask 1031168   ;;  %s396_s9 = smov [#allocation2]   ;;  %s397_s13 = smov 128  }
   0x6   :  { %v42_v15 = vadd.f32 %v41_v13, %v37_v12  ;;  %v137_v47 = vld [vmem:[%s541_s2] sm:$0xff]  ;;  %v138_v54 = vld [vmem:[%s541_s2 + $0x8] sm:$0xff]  ;;  %s394_s2 = smov 126   ;;  %vm200_vm11 = vcmask 1039360   ;;  %vm246_vm12 = vcmask 392192   ;;  %s300_s10 = sshll.u32 %s396_s9, 4  ;;  %s301_s10 = int_to_ptr.vmem [resolvable:$true] %s300_s10 }
   0x7   :  { %47 = vadd.xlane.f32.xlu0 %v46_v10  ;;  %v219_v57 = vld [vmem:[%s544_s5 + $0x8] sm:$0xff]  ;;  %v493_v62 = vand.u32 127, %v175_v61  ;;  %s398_s1 = smov 8  }
   0x9   :  { %v177_v4 = vadd.s32 128, %v493_v62  ;;  %vm178_vm8 = vcmp.ge.s32.totalorder %v493_v62, 1 }
   0xb   :  { %vm181_vm9 = vcmp.lt.s32.totalorder %v177_v4, 129 }
   0xd   :  { %31 = vadd.xlane.f32.xlu1 %v30_v14 }
   0xf   :  { %43 = vadd.xlane.f32.xlu0 %v42_v15 }
  0x78   :  { %v36_v18 = vpop.xlane.xlu1 %35 }
  0x7a   :  { %v48_v17 = vpop.xlane.xlu0 %47 }
  0x7b   :  { %78 = vmatpush.msra.mxu0 %v48_v17  ;;  %324 = vmatpush.msra.mxu3 %v48_v17 }
  0x80   :  { %v32_v20 = vpop.xlane.xlu1 %31 }
  0x82   :  { %v44_v19 = vpop.xlane.xlu0 %43 }
  0x83   :  { %79 = vmatpush.msra.mxu0 %v44_v19  ;;  %325 = vmatpush.msra.mxu3 %v44_v19 }
  0x85   :  { %80 = vmatpush.msra.mxu0 %v36_v18  ;;  %326 = vmatpush.msra.mxu3 %v36_v18 }
  0x87   :  { %81 = vmatpush.msra.mxu0 %v32_v20  ;;  %327 = vmatpush.msra.mxu3 %v32_v20 }
  0x88   :  { %314 = vmatmul.msk.f32.vlgmr.msra.gmra.mxu0 %vm53_vm1, %v49_v21  ;;  %315 = vmatmul.msk.f32.vlgmr.msra.gmra.mxu3 %vm53_vm1, %v50_v22 }
  0x90   :  { %316 = vmatmul.msk.f32.gmra.mxu3 %vm53_vm1, %v51_v23 }
  0x98   :  { %317 = vmatmul.msk.f32.gmra.mxu3 %vm53_vm1, %v52_v24 }
 0x105   :  { %v83_v25 = vpop.f32.mrf.mxu0 }
 0x106   :  { %125 = vperm.xlu2 %340, %v83_v25   ;;  %v95_v27 = vmul.f32 %v83_v25, %v83_v25  ;;  %v218_v25 = vld [vmem:[%s544_s5] sm:$0xff] }
 0x10b   :  { %v86_v26 = vpop.f32.mrf.mxu3 }
 0x10c   :  { %v96_v33 = vmul.f32 %v86_v26, %v86_v26 }
 0x10e   :  { %130 = vperm.xlu2 %340, %v86_v26   ;;  %v221_v26 = vld [vmem:[%s544_s5 + $0x18] sm:$0xff] }
 0x113   :  { %v89_v28 = vpop.f32.mrf.mxu3 }
 0x114   :  { %v97_v29 = vsub.f32 %v89_v28, %v95_v27  ;;  %v220_v27 = vld [vmem:[%s544_s5 + $0x10] sm:$0xff] }
 0x116   :  { %v99_v30 = vmax.f32 %v97_v29, 0.0  ;;  %164 = vperm.xlu2 %340, %v156_v31  }
 0x118   :  { %v101_v32 = vadd.f32 1e-05, %v99_v30 }
 0x11a   :  { %363 = vrsqrt.f32 %v101_v32  ;;  %vm109_vm3 = vweird.f32 %v101_v32 }
 0x11b   :  { %v92_v34 = vpop.f32.mrf.mxu3 }
 0x11c   :  { %v98_v35 = vsub.f32 %v92_v34, %v96_v33 }
 0x11e   :  { %v100_v36 = vmax.f32 %v98_v35, 0.0  ;;  %159 = vperm.xlu2 %340, %v155_v37  }
 0x120   :  { %v364_v38 = vpop.eup %363  ;;  %v102_v39 = vadd.f32 1e-05, %v100_v36 }
 0x121   :  { %v104_v40 = vmul.f32 %v364_v38, %v101_v32  ;;  %vm110_vm2 = vweird.f32 %v364_v38 }
 0x122   :  { %365 = vrsqrt.f32 %v102_v39  ;;  %vm111_vm4 = vmor %vm109_vm3, %vm110_vm2  ;;  %vm119_vm6 = vweird.f32 %v102_v39 }
 0x123   :  { %v105_v41 = vmul.f32 %v364_v38, %v104_v40 }
 0x125   :  { %v106_v42 = vmul.f32 0.5, %v105_v41 }
 0x127   :  { %v107_v43 = vsub.f32 1.5, %v106_v42 }
 0x128   :  { %v366_v44 = vpop.eup %365 }
 0x129   :  { %v114_v45 = vmul.f32 %v366_v44, %v102_v39  ;;  %v108_v46 = vmul.f32 %v364_v38, %v107_v43  ;;  %vm120_vm5 = vweird.f32 %v366_v44 }
 0x12a   :  { %vm121_vm7 = vmor %vm119_vm6, %vm120_vm5 }
 0x12b   :  { %v115_v48 = vmul.f32 %v366_v44, %v114_v45  ;;  %v112_v49 = vsel %vm111_vm4, %v364_v38, %v108_v46  ;;  %v244_v45 = vld [vmem:[%s543_s4 + $0x10] sm:$0xff]  ;;  %v243_v46 = vld [vmem:[%s543_s4 + $0x8] sm:$0xff] }
 0x12c   :  { %v139_v50 = vmul.f32 %v137_v47, %v112_v49  ;;  %v245_v47 = vld [vmem:[%s543_s4 + $0x18] sm:$0xff] }
 0x12d   :  { %v116_v51 = vmul.f32 0.5, %v115_v48 }
 0x12e   :  { %143 = vperm.xlu1 %342, %v139_v50  }
 0x12f   :  { %v117_v52 = vsub.f32 1.5, %v116_v51 }
 0x131   :  { %v118_v53 = vmul.f32 %v366_v44, %v117_v52 }
 0x133   :  { %v122_v55 = vsel %vm121_vm7, %v366_v44, %v118_v53  ;;  %v242_v44 = vld [vmem:[%s543_s4] sm:$0xff]  ;;  %s302_s4 = sshll.u32 %s545_s6, 4  ;;  %s303_s4 = int_to_ptr.hbm [resolvable:$true] %s302_s4 }
 0x134   :  { %v140_v56 = vmul.f32 %v138_v54, %v122_v55 }
 0x136   :  { %148 = vperm.xlu0 %341, %v140_v56  }
 0x13e   :  { %229 = vperm.xlu0 %341, %v219_v57  }
 0x160   :  { %v126_v58 = vpop.permute.xlu2 %125 }
 0x161   :  { %v133_v63 = vsub.f32 %v458_v8, %v126_v58  ;;  %v134_v2 = vsub.f32 %v452_v5, %v126_v58 }
 0x168   :  { %v131_v59 = vpop.permute.xlu2 %130 }
 0x169   :  { %v135_v14 = vsub.f32 %v437_v0, %v131_v59  ;;  %v136_v15 = vsub.f32 %v442_v1, %v131_v59 }
 0x170   :  { %v165_v60 = vpop.permute.xlu2 %164 }
 0x178   :  { %v160_v9 = vpop.permute.xlu2 %159 }
 0x1a0   :  { %v144_v3 = vpop.permute.xlu1 %143 }
 0x1a1   :  { %v151_v6 = vmul.f32 %v144_v3, %v133_v63  ;;  %v152_v7 = vmul.f32 %v144_v3, %v134_v2 }
 0x1a3   :  { %v167_v10 = vadd.f32 %v160_v9, %v151_v6  ;;  %v168_v11 = vadd.f32 %v160_v9, %v152_v7 }
 0x1a5   :  { %v171_v12 = vmax.f32 %v167_v10, 0.0  ;;  %v172_v13 = vmax.f32 %v168_v11, 0.0 }
 0x1a7   :  { %v184_v5 = vsel %vm178_vm8, %v171_v12, 0.0  ;;  %v185_v8 = vsel %vm181_vm9, %v172_v13, 0.0 }
 0x1a8   :  { %v149_v16 = vpop.permute.xlu0 %148  ;;  %v343_v17 = vpack.i.bf16 %v185_v8, %v184_v5 }
 0x1a9   :  { %v153_v18 = vmul.f32 %v149_v16, %v135_v14  ;;  %v154_v19 = vmul.f32 %v149_v16, %v136_v15 }
 0x1aa   :  { %344 = vrot.lane.b32.xlu2 %v343_v17, %s394_s2 }
 0x1ab   :  { %v169_v20 = vadd.f32 %v165_v60, %v153_v18  ;;  %v170_v21 = vadd.f32 %v165_v60, %v154_v19 }
 0x1ad   :  { %v173_v22 = vmax.f32 %v169_v20, 0.0  ;;  %v174_v23 = vmax.f32 %v170_v21, 0.0 }
 0x1af   :  { %v186_v0 = vsel %vm178_vm8, %v173_v22, 0.0  ;;  %v187_v1 = vsel %vm181_vm9, %v174_v23, 0.0 }
 0x1b0   :  { %v353_v24 = vpack.i.bf16 %v187_v1, %v186_v0  ;;  %v230_v54 = vpop.permute.xlu0 %229 }
 0x1b2   :  { %354 = vrot.lane.b32.xlu1 %v353_v24, %s395_s20  ;;  %349 = vrot.lane.b32.xlu2 %v353_v24, %s394_s2 }
 0x1ba   :  { %224 = vperm.xlu1 %342, %v218_v25   ;;  %359 = vrot.lane.b32.xlu2 %v343_v17, %s395_s20 }
 0x1c2   :  { %239 = vperm.xlu1 %342, %v221_v26   ;;  %234 = vperm.xlu2 %340, %v220_v27  }
 0x204   :  { %v345_v28 = vpop.permute.xlu2 %344 }
 0x205   :  { %v347_v30 = vunpack.i.h.bf16 %v345_v28  ;;  %v346_v31 = vunpack.i.l.bf16 %v345_v28 }
 0x207   :  { %v214_v35 = vsel %vm213_vm10, %v346_v31, %v347_v30 }
 0x20c   :  { %v350_v29 = vpop.permute.xlu2 %349 }
 0x20d   :  { %v352_v32 = vunpack.i.h.bf16 %v350_v29  ;;  %v351_v33 = vunpack.i.l.bf16 %v350_v29 }
 0x20f   :  { %v215_v34 = vsel %vm213_vm10, %v351_v33, %v352_v32 }
 0x210   :  { %269 = vmatpush.msra.mxu1 %v215_v34  ;;  %328 = vmatpush.msra.mxu2 %v215_v34 }
 0x212   :  { %270 = vmatpush.msra.mxu1 %v214_v35  ;;  %329 = vmatpush.msra.mxu2 %v214_v35 }
 0x214   :  { %v360_v36 = vpop.permute.xlu2 %359 }
 0x215   :  { %v362_v38 = vunpack.i.h.bf16 %v360_v36  ;;  %v361_v39 = vunpack.i.l.bf16 %v360_v36 }
 0x217   :  { %v201_v43 = vsel %vm200_vm11, %v361_v39, %v362_v38 }
 0x21c   :  { %v235_v51 = vpop.permute.xlu2 %234 }
 0x224   :  { %v355_v37 = vpop.permute.xlu1 %354 }
 0x225   :  { %v357_v40 = vunpack.i.h.bf16 %v355_v37  ;;  %v356_v41 = vunpack.i.l.bf16 %v355_v37 }
 0x227   :  { %v202_v42 = vsel %vm200_vm11, %v356_v41, %v357_v40 }
 0x228   :  { %271 = vmatpush.msra.mxu1 %v202_v42  ;;  %330 = vmatpush.msra.mxu2 %v202_v42 }
 0x22a   :  { %272 = vmatpush.msra.mxu1 %v201_v43  ;;  %331 = vmatpush.msra.mxu2 %v201_v43 }
 0x22c   :  { %318 = vmatpush.msk.msra.mxu1 %vm178_vm8, %v173_v22  ;;  %332 = vmatpush.msk.msra.mxu2 %vm178_vm8, %v173_v22  ;;  %v225_v48 = vpop.permute.xlu1 %224 }
 0x22e   :  { %319 = vmatpush.msk.msra.mxu1 %vm178_vm8, %v171_v12  ;;  %333 = vmatpush.msk.msra.mxu2 %vm178_vm8, %v171_v12 }
 0x22f   :  { %320 = vmatmul.msk.f32.vlgmr.msra.gmra.mxu1 %vm246_vm12, %v242_v44  ;;  %322 = vmatmul.msk.f32.vlgmr.msra.gmra.mxu2 %vm246_vm12, %v244_v45 }
 0x234   :  { %v240_v57 = vpop.permute.xlu1 %239 }
 0x237   :  { %321 = vmatmul.msk.f32.gmra.mxu1 %vm246_vm12, %v243_v46  ;;  %323 = vmatmul.msk.f32.gmra.mxu2 %vm246_vm12, %v245_v47 }
 0x2ac   :  { %v276_v49 = vpop.f32.mrf.mxu1 }
 0x2ad   :  { %v288_v50 = vadd.f32 %v276_v49, %v225_v48 }
 0x2af   :  { %292 = vst [vmem:[#allocation2] sm:$0xff] %v288_v50 }
 0x2b2   :  { %v282_v52 = vpop.f32.mrf.mxu2 }
 0x2b3   :  { %v290_v53 = vadd.f32 %v282_v52, %v235_v51 }
 0x2b4   :  { %v279_v55 = vpop.f32.mrf.mxu1 }
 0x2b5   :  { %294 = vst [vmem:[#allocation2 + $0x10] sm:$0xff] %v290_v53  ;;  %v289_v56 = vadd.f32 %v279_v55, %v230_v54 }
 0x2b7   :  { %293 = vst [vmem:[#allocation2 + $0x8] sm:$0xff] %v289_v56 }
 0x2ba   :  { %v285_v58 = vpop.f32.mrf.mxu2 }
 0x2bb   :  { %v291_v59 = vadd.f32 %v285_v58, %v240_v57 }
 0x2bd   :  { %295 = vst [vmem:[#allocation2 + $0x18] sm:$0xff] %v291_v59 }
 0x2be   :  { %308 = dma.vmem_to_hbm [thread:$0]  %s301_s10, 512, %s303_s4, [#allocation3], %s397_s13, %s397_s13, %s398_s1  }
 0x2bf   :  { %391 = dma.done.wait [#allocation3], 512  }
 0x2c0   :  { %392 = vsyncadd [#allocation3], 4294966784 }
 0x2c1   :  { %313 = vsyncpa [#allocation3], 1 }

</bundles_post_ra>
